<compile_context>
chip_gen: v5e
topology: v5e:2x2
jax: 0.10.0
libtpu: 0.0.40
codegen_flags: <defaults>
</compile_context>

<pallas_src>
import math

import jax
import jax.numpy as jnp
from jax.experimental import pallas as pl
from jax.experimental.pallas import tpu as pltpu


_PER_BUFFER_BYTES = 2 * 1024 * 1024    # per double-buffered x / y tile
_MIN_GRID_STEPS = 8                    # DMA pipelining + v7x dual-TC sharding
_VMEM_LIMIT_BYTES = 32 * 1024 * 1024   # 4 x 2 MiB tiles + gamma + headroom


def _cdiv(a: int, b: int) -> int:
    return -(-a // b)


def _sublane_multiple(dtype) -> int:
    # Packed sublane count: f32 -> 8, bf16/f16 -> 16, int8/fp8 -> 32.
    itemsize = jnp.dtype(dtype).itemsize
    return max(8, 32 // max(itemsize, 1))


def _layerscale_kernel(x_ref, gamma_ref, o_ref):
    # x_ref:     (TM, TN) tile of x in VMEM
    # gamma_ref: (1, TN)  f32 scale row, broadcast over sublanes
    # Multiply in f32 (the kernel is DMA-bound; the VPU has slack) and cast
    # once on store.
    x = x_ref[...].astype(jnp.float32)
    o_ref[...] = (x * gamma_ref[...]).astype(o_ref.dtype)


def _tile_plan(rows_l: int, DL: int, dtype):
    """Pick (tm, tn, grid_rows, grid_cols) for a (rows_l, DL) array."""
    itemsize = jnp.dtype(dtype).itemsize
    sub = _sublane_multiple(dtype)

    # Lane-axis tiling only when a single `sub`-row strip at full width would
    # already exceed the per-buffer budget (very wide D).  Keeps every
    # double-buffered tile bounded, including on v7x's 64 MiB VMEM.
    tn = DL
    if DL % 128 == 0 and sub * DL * itemsize > _PER_BUFFER_BYTES:
        q = DL // 128
        tn = 128
        for d in range(q, 0, -1):
            if q % d == 0 and 128 * d * sub * itemsize <= _PER_BUFFER_BYTES:
                tn = 128 * d
                break
    grid_cols = _cdiv(DL, tn)

    # Row tile: largest multiple of the packed sublane count under the VMEM
    # budget, but small enough that the total grid has >= _MIN_GRID_STEPS
    # steps whenever the array permits (pipeline overlap + dual-TC sharding).
    tm_cap = max(sub, (_PER_BUFFER_BYTES // (tn * itemsize)) // sub * sub)
    min_row_steps = max(1, _cdiv(_MIN_GRID_STEPS, grid_cols))
    tm_steps = max(sub, _cdiv(_cdiv(rows_l, min_row_steps), sub) * sub)
    tm = min(tm_cap, tm_steps)
    if rows_l <= tm:
        tm = rows_l            # block == full dim -> always layout-legal
        grid_rows = 1
    else:
        grid_rows = _cdiv(rows_l, tm)
    return tm, tn, grid_rows, grid_cols


def _layer_scale_2d(x2: jax.Array, gamma_row_f32: jax.Array,
                    *, inplace: bool = False) -> jax.Array:
    rows_l, DL = x2.shape
    tm, tn, grid_rows, grid_cols = _tile_plan(rows_l, DL, x2.dtype)

    extra = {}
    if inplace:
        # Closest functional analogue of torch's x.mul_: let XLA reuse x's
        # buffer for the output when it is dead after this op.
        extra["input_output_aliases"] = {0: 0}

    return pl.pallas_call(
        _layerscale_kernel,
        out_shape=jax.ShapeDtypeStruct((rows_l, DL), x2.dtype),
        grid_spec=pltpu.PrefetchScalarGridSpec(
            num_scalar_prefetch=0,
            grid=(grid_rows, grid_cols),
            in_specs=[
                pl.BlockSpec((tm, tn), lambda i, j: (i, j)),
                # gamma is tiny -- keep the (1, tn) f32 row resident.
                pl.BlockSpec((1, tn), lambda i, j: (0, j)),
            ],
            out_specs=pl.BlockSpec((tm, tn), lambda i, j: (i, j)),
        ),
        compiler_params=pltpu.CompilerParams(
            # Independent tiles on both axes: mem-bound streaming, lets v7x
            # shard across its 2 TensorCores; measured no-op on v5e/v6e.
            dimension_semantics=("parallel", "parallel"),
            vmem_limit_bytes=_VMEM_LIMIT_BYTES,
        ),
        **extra,
    )(x2, gamma_row_f32)


def layer_scale(x: jax.Array, gamma: jax.Array, *, inplace: bool = False) -> jax.Array:
    """y = x * gamma with gamma (dim,) broadcast over the last dim of x."""
    *lead, D = x.shape
    assert gamma.shape == (D,)
    rows = 1
    for s in lead:
        rows *= s
    if rows == 0:
        return x

    x2 = x.reshape(rows, D)
    gamma_f32 = gamma.astype(jnp.float32)

    # Lane-dense folding for D % 128 != 0: fold k rows into the lane axis so
    # output stores are unmasked vst's (biggest measured single lever for
    # narrow channel dims).
    k = 1
    if D % 128 != 0:
        k_try = 128 // math.gcd(D, 128)
        if rows >= k_try:
            k = k_try
    rem = rows % k
    bulk = rows - rem

    outs = []
    if bulk > 0:
        xb = x2[:bulk].reshape(bulk // k, k * D)
        gb = jnp.tile(gamma_f32, (k,)).reshape(1, k * D)
        yb = _layer_scale_2d(xb, gb, inplace=inplace)
        outs.append(yb.reshape(bulk, D))
    if rem > 0:
        # Tiny (< k rows) remainder: plain XLA, same f32 math.
        # TODO(synk): fold the remainder into a second padded kernel call if
        # the concatenate copy ever shows up in a profile.
        yr = (x2[bulk:].astype(jnp.float32) * gamma_f32).astype(x.dtype)
        outs.append(yr)

    out2 = outs[0] if len(outs) == 1 else jnp.concatenate(outs, axis=0)
    # TODO(synk): if the caller immediately does `x + drop_path(ls(x))`, fuse
    # that residual add into this kernel to save a full HBM round-trip.
    return out2.reshape(x.shape)


if __name__ == "__main__":
    key = jax.random.PRNGKey(0)
    init_values = 1e-05

    # --- Check 1: module-default small shape, f32, narrow D (lane-fold path) -
    B, N, D = 2, 8, 32
    gamma = init_values * jnp.ones((D,), dtype=jnp.float32)
    x = jax.random.normal(key, (B, N, D), dtype=jnp.float32)
    y = jax.block_until_ready(layer_scale(x, gamma))
    y_ref = x * gamma
    assert y.shape == x.shape and y.dtype == x.dtype
    assert jnp.allclose(y, y_ref, atol=1e-6, rtol=1e-6)

    # --- Check 2: bf16 input, lane-aligned D (no-fold path, f32 math) --------
    D2 = 128
    gamma2 = init_values * jnp.ones((D2,), dtype=jnp.float32)
    x2 = jax.random.normal(jax.random.PRNGKey(1), (B, N, D2), dtype=jnp.bfloat16)
    y2 = jax.block_until_ready(layer_scale(x2, gamma2))
    y2_ref = (x2.astype(jnp.float32) * gamma2).astype(jnp.bfloat16)
    assert y2.dtype == jnp.bfloat16
    assert jnp.allclose(y2.astype(jnp.float32), y2_ref.astype(jnp.float32),
                        atol=1e-2, rtol=1e-2)

    # --- Check 3: bigger folded case with a multi-step grid ------------------
    D3 = 96                                        # k = 4 -> DL = 384
    gamma3 = init_values * jnp.ones((D3,), dtype=jnp.float32)
    x3 = jax.random.normal(jax.random.PRNGKey(2), (4, 256, D3), dtype=jnp.float32)
    y3 = jax.block_until_ready(layer_scale(x3, gamma3))
    assert jnp.allclose(y3, x3 * gamma3, atol=1e-6, rtol=1e-6)

    # --- Check 4: rows not divisible by the fold factor (remainder path) -----
    x4 = jax.random.normal(jax.random.PRNGKey(3), (3, 5, D3), dtype=jnp.float32)
    y4 = jax.block_until_ready(layer_scale(x4, gamma3))
    assert jnp.allclose(y4, x4 * gamma3, atol=1e-6, rtol=1e-6)

    print("KERNEL_OK")
</pallas_src>

<mosaic_0001>
module attributes {stable_mosaic.version = 11 : i64} {
  func.func @_layerscale_kernel(%arg0: i32, %arg1: i32, %arg2: memref<4x128xf32, #tpu.memory_space<vmem>>, %arg3: memref<1x128xf32, #tpu.memory_space<vmem>>, %arg4: memref<4x128xf32, #tpu.memory_space<vmem>>) attributes {dimension_semantics = [#tpu.dimension_semantics<parallel>, #tpu.dimension_semantics<parallel>], iteration_bounds = array<i64: 1, 1>, scalar_prefetch = 0 : i64, scratch_operands = 0 : i64, tpu.core_type = #tpu.core_type<tc>, window_params = [{transform_indices = @transform_0, window_bounds = array<i64: 4, 128>}, {transform_indices = @transform_1, window_bounds = array<i64: 1, 128>}, {transform_indices = @transform_2, window_bounds = array<i64: 4, 128>}]} {
    %c0 = arith.constant 0 : index
    %c0_0 = arith.constant 0 : index
    %0 = vector.load %arg2[%c0, %c0_0] : memref<4x128xf32, #tpu.memory_space<vmem>>, vector<4x128xf32>
    %c0_1 = arith.constant 0 : index
    %c0_2 = arith.constant 0 : index
    %1 = vector.load %arg3[%c0_1, %c0_2] : memref<1x128xf32, #tpu.memory_space<vmem>>, vector<1x128xf32>
    %2 = vector.broadcast %1 : vector<1x128xf32> to vector<4x128xf32>
    %3 = arith.mulf %0, %2 : vector<4x128xf32>
    %c0_3 = arith.constant 0 : index
    %c0_4 = arith.constant 0 : index
    %4 = vector.load %arg4[%c0_3, %c0_4] : memref<4x128xf32, #tpu.memory_space<vmem>>, vector<4x128xf32>
    tpu.vector_store %arg4[%c0_3, %c0_4], %3 {strides = array<i32>} : memref<4x128xf32, #tpu.memory_space<vmem>>, vector<4x128xf32>,
    return
  }
  func.func @transform_0(%arg0: i32, %arg1: i32) -> (i32, i32) {
    %c0_i32 = arith.constant 0 : i32
    return %arg0, %arg1 : i32, i32
  }
  func.func @transform_1(%arg0: i32, %arg1: i32) -> (i32, i32) {
    %c0_i32 = arith.constant 0 : i32
    %c0_i32_0 = arith.constant 0 : i32
    return %c0_i32, %arg1 : i32, i32
  }
  func.func @transform_2(%arg0: i32, %arg1: i32) -> (i32, i32) {
    %c0_i32 = arith.constant 0 : i32
    return %arg0, %arg1 : i32, i32
  }
}

</mosaic_0001>

<bundles_post_ra>
// kernel: tpu_custom_call.1
= control target key start
LH: loop header
LB: loop body
LE: loop exit
PB: predicated region body
PF: predicated region fallthrough
CT: control target
= control target key end

     0   :  { %7 = vsyncpa [#allocation3], 0  ;;  %s174_s0 = inlined_call_operand.hbm [shape: f32[4,128], index: 0, kind: input, shape index: {}]   ;;  %s175_s1 = inlined_call_operand.hbm [shape: f32[1,128], index: 1, kind: input, shape index: {}]   ;;  %s176_s2 = inlined_call_operand.hbm [shape: f32[4,128], index: 2, kind: output, shape index: {}]  }
   0x1   :  { %8 = vsyncpa [#allocation6], 0 }
   0x2   :  { %9 = vsyncpa [#allocation4], 0  ;;  %s15_s11 = sshll.u32 %s174_s0, 4  ;;  %s147_s12 = smov [#allocation2]   ;;  %s16_s11 = int_to_ptr.hbm [resolvable:$true] %s15_s11 }
   0x3   :  { %s17_s13 = sshll.u32 %s147_s12, 4  ;;  %s26_s16 = sshll.u32 %s175_s1, 4  ;;  %s18_s13 = int_to_ptr.vmem [resolvable:$true] %s17_s13  ;;  %s27_s16 = int_to_ptr.hbm [resolvable:$true] %s26_s16 }
   0x4   :  { %20 = dma.hbm_to_vmem [thread:$0]  %s16_s11, 64, %s18_s13, [#allocation3]  }
   0x5   :  { %s148_s17 = smov [#allocation5]  }
   0x6   :  { %s28_s18 = sshll.u32 %s148_s17, 4  ;;  %s29_s18 = int_to_ptr.vmem [resolvable:$true] %s28_s18 }
   0x7   :  { %31 = dma.hbm_to_vmem [thread:$0]  %s27_s16, 16, %s29_s18, [#allocation6]  }
   0x8   :  { %141 = dma.done.wait [#allocation3], 64  }
   0x9   :  { %142 = vsyncadd [#allocation3], 4294967232 }
   0xa   :  { %143 = dma.done.wait [#allocation6], 16  }
   0xb   :  { %144 = vsyncadd [#allocation6], 4294967280  ;;  %s149_s19 = smov [#allocation7]   ;;  %s54_s22 = sshll.u32 %s176_s2, 4  ;;  %v40_v0 = vld [vmem:[#allocation2] sm:$0xf]  ;;  %s55_s22 = int_to_ptr.hbm [resolvable:$true] %s54_s22 }
   0xc   :  { %s52_s0 = sshll.u32 %s149_s19, 4  ;;  %v68_v1 = vld [vmem:[#allocation5] ss:$0 sm:$0xff]  ;;  %s53_s0 = int_to_ptr.vmem [resolvable:$true] %s52_s0 }
   0xd   :  { %v45_v2 = vmul.f32 %v68_v1, %v40_v0 }
   0xf   :  { %46 = vst [vmem:[#allocation7] sm:$0xf] %v45_v2 }
  0x10   :  { %57 = dma.vmem_to_hbm [thread:$0]  %s53_s0, 64, %s55_s22, [#allocation4]  }
  0x11   :  { %145 = dma.done.wait [#allocation4], 64  }
  0x12   :  { %146 = vsyncadd [#allocation4], 4294967232 }
  0x13   :  { %62 = vsyncpa [#allocation3], 1 }
  0x14   :  { %63 = vsyncpa [#allocation6], 1 }
  0x15   :  { %64 = vsyncpa [#allocation4], 1 }

</bundles_post_ra>
